<compile_context>
chip_gen: v6e
topology: v6e:2x2x1
jax: 0.10.0
libtpu: 0.0.40
codegen_flags: <defaults>
</compile_context>

<pallas_src>
import functools

import jax
import jax.numpy as jnp
from jax import lax
from jax.experimental import pallas as pl
from jax.experimental.pallas import tpu as pltpu


def _loss_kernel(mel_len_ref, src_meta_ref, mel_ref, mel_tgt_ref,
                 dpe_ref, dpe_tgt_ref, out_ref, *, n_mel, chunk_t):
    c = pl.program_id(1)                       # mel-chunk index
    bb, ct = mel_ref.shape                     # (block_b, chunk_t)
    rows, t_src = dpe_ref.shape                # (block_b*3, T_src)

    # ---- mel chunk: masked per-sample MAE partial ------------------------
    mel_l = mel_len_ref[...]                   # (bb, 1) int32 mel lengths
    diff = jnp.abs(mel_ref[...].astype(jnp.float32)
                   - mel_tgt_ref[...].astype(jnp.float32))
    lane = lax.broadcasted_iota(jnp.int32, (bb, ct), 1)
    flat_idx = lane + c * chunk_t              # global flattened frame*mel idx
    valid = mel_l * n_mel                      # (bb, 1) valid flat extent
    masked = jnp.where(flat_idx < valid, diff, 0.0)
    denom = jnp.maximum(valid.astype(jnp.float32), 1.0)
    mel_partial = jnp.sum(jnp.sum(masked, axis=1, keepdims=True) / denom)
    # padded / zero-length rows and edge-block garbage: mask -> exactly 0.

    # ---- d/p/e rows: masked per-row MSE (counted only at chunk 0) --------
    src_l = src_meta_ref[:, 0:1]               # (rows, 1) src lengths
    ch = src_meta_ref[:, 1:2]                  # (rows, 1) channel id 0/1/2
    d = dpe_ref[...].astype(jnp.float32) - dpe_tgt_ref[...].astype(jnp.float32)
    sq = d * d
    sidx = lax.broadcasted_iota(jnp.int32, (rows, t_src), 1)
    masked2 = jnp.where(sidx < src_l, sq, 0.0)
    per_row = (jnp.sum(masked2, axis=1, keepdims=True)
               / jnp.maximum(src_l.astype(jnp.float32), 1.0))
    scale = jnp.where(c == 0, jnp.float32(1.0), jnp.float32(0.0))
    d_sum = jnp.sum(jnp.where(ch == 0, per_row, 0.0)) * scale
    p_sum = jnp.sum(jnp.where(ch == 1, per_row, 0.0)) * scale
    e_sum = jnp.sum(jnp.where(ch == 2, per_row, 0.0)) * scale

    # ---- single fused (1,1,1,4) store per grid step -----------------------
    lane4 = lax.broadcasted_iota(jnp.int32, (1, 4), 1)
    row = (jnp.where(lane4 == 0, mel_partial, 0.0)
           + jnp.where(lane4 == 1, d_sum, 0.0)
           + jnp.where(lane4 == 2, p_sum, 0.0)
           + jnp.where(lane4 == 3, e_sum, 0.0))
    out_ref[...] = row.reshape(1, 1, 1, 4)


def stylespeech_loss(mel, mel_target,
                     log_d_predicted, log_d_target,
                     p_predicted, p_target,
                     e_predicted, e_target,
                     src_len, mel_len):
    B, T_mel, n_mel = mel.shape
    T_src = log_d_predicted.shape[1]
    T_flat = T_mel * n_mel

    # Batch chunk: must divide B exactly so the big mel slabs are never padded.
    # (B is usually a multiple of 8 in training; otherwise use one full block.)
    block_b = 8 if (B % 8 == 0) else B
    G_b = B // block_b

    # Mel chunk along the flattened (frames * n_mel) axis: lane-dense, sized so
    # 2 inputs x 2 pipeline buffers stay around ~4 MiB regardless of T_mel.
    mel_isize = jnp.dtype(mel.dtype).itemsize
    budget = 4 * 1024 * 1024
    max_chunk = max(128, (budget // (4 * block_b * mel_isize)) // 128 * 128)
    chunk_t = T_flat if T_flat <= max_chunk else max_chunk
    C = pl.cdiv(T_flat, chunk_t)

    # Lane-dense mel slabs (free reshape of contiguous trailing dims).
    mel_flat = mel.reshape(B, T_flat)
    mel_tgt_flat = mel_target.reshape(B, T_flat)

    # d/p/e stacked without a padded size-3 sublane dim: rows are
    # [b0:d, b0:p, b0:e, b1:d, ...].
    dpe_pred = jnp.stack(
        [log_d_predicted, p_predicted, e_predicted], axis=1).reshape(B * 3, T_src)
    dpe_tgt = jnp.stack(
        [log_d_target, p_target, e_target], axis=1).reshape(B * 3, T_src)

    # Tiny metadata tables (no padding needed: their first dim divides evenly).
    mel_len_col = mel_len.astype(jnp.int32).reshape(B, 1)
    src_meta = jnp.stack(
        [jnp.repeat(src_len.astype(jnp.int32), 3),
         jnp.tile(jnp.arange(3, dtype=jnp.int32), B)], axis=1)   # (B*3, 2)

    mel_len_spec = pl.BlockSpec((block_b, 1), lambda g, c: (g, 0))
    src_meta_spec = pl.BlockSpec((block_b * 3, 2), lambda g, c: (g, 0))
    mel_spec = pl.BlockSpec((block_b, chunk_t), lambda g, c: (g, c))
    dpe_spec = pl.BlockSpec((block_b * 3, T_src), lambda g, c: (g, 0))
    out_spec = pl.BlockSpec((1, 1, 1, 4), lambda g, c: (g, c, 0, 0))

    grid_spec = pltpu.PrefetchScalarGridSpec(
        num_scalar_prefetch=0,
        grid=(G_b, C),
        in_specs=[mel_len_spec, src_meta_spec, mel_spec, mel_spec,
                  dpe_spec, dpe_spec],
        out_specs=out_spec,
    )

    out_shape = jax.ShapeDtypeStruct((G_b, C, 1, 4), jnp.float32)

    dpe_isize = jnp.dtype(log_d_predicted.dtype).itemsize
    # Per-step VMEM footprint (2 inputs x 2 buffers each) + headroom.
    vmem_bytes = (4 * block_b * chunk_t * mel_isize
                  + 4 * block_b * 3 * T_src * dpe_isize
                  + (2 << 20))
    vmem_limit = int(min(max(vmem_bytes, 8 << 20), 48 << 20))

    cost = pl.CostEstimate(
        flops=int(4 * B * T_flat + 5 * B * 3 * T_src),
        transcendentals=0,
        bytes_accessed=int(2 * B * T_flat * mel_isize
                           + 2 * B * 3 * T_src * dpe_isize
                           + B * 4 * 4 + G_b * C * 4 * 4),
    )

    partials = pl.pallas_call(
        functools.partial(_loss_kernel, n_mel=n_mel, chunk_t=chunk_t),
        out_shape=out_shape,
        grid_spec=grid_spec,
        compiler_params=pltpu.CompilerParams(
            # Every (batch-chunk, mel-chunk) step owns its own output row ->
            # no resident accumulator -> both axes shard freely across cores.
            dimension_semantics=("parallel", "parallel"),
            vmem_limit_bytes=vmem_limit),
        cost_estimate=cost,
    )(mel_len_col, src_meta, mel_flat, mel_tgt_flat, dpe_pred, dpe_tgt)

    totals = jnp.sum(partials, axis=(0, 1, 2)) / B       # (4,)
    return totals[0], totals[1], totals[2], totals[3]


def _reference_loss(mel, mel_target, log_d_pred, log_d_tgt,
                    p_pred, p_tgt, e_pred, e_tgt, src_len, mel_len):
    """Pure-JAX reference mirroring the PyTorch loop."""
    B = mel.shape[0]
    mel_loss = d_loss = p_loss = e_loss = 0.0
    for b in range(B):
        ml = int(mel_len[b]); sl = int(src_len[b])
        mel_loss += jnp.mean(jnp.abs(mel[b, :ml, :] - mel_target[b, :ml, :]))
        d_loss += jnp.mean((log_d_pred[b, :sl] - log_d_tgt[b, :sl]) ** 2)
        p_loss += jnp.mean((p_pred[b, :sl] - p_tgt[b, :sl]) ** 2)
        e_loss += jnp.mean((e_pred[b, :sl] - e_tgt[b, :sl]) ** 2)
    return mel_loss / B, d_loss / B, p_loss / B, e_loss / B


if __name__ == "__main__":
    key = jax.random.PRNGKey(0)
    B, T_mel, n_mel, T_src = 2, 16, 16, 8

    ks = jax.random.split(key, 8)
    mel = jax.random.normal(ks[0], (B, T_mel, n_mel), jnp.float32)
    mel_target = jax.random.normal(ks[1], (B, T_mel, n_mel), jnp.float32)
    log_d_pred = jax.random.normal(ks[2], (B, T_src), jnp.float32)
    log_d_tgt = jax.random.normal(ks[3], (B, T_src), jnp.float32)
    p_pred = jax.random.normal(ks[4], (B, T_src), jnp.float32)
    p_tgt = jax.random.normal(ks[5], (B, T_src), jnp.float32)
    e_pred = jax.random.normal(ks[6], (B, T_src), jnp.float32)
    e_tgt = jax.random.normal(ks[7], (B, T_src), jnp.float32)

    mel_len = jnp.array([12, 16], jnp.int32)
    src_len = jnp.array([5, 8], jnp.int32)

    outs = stylespeech_loss(mel, mel_target, log_d_pred, log_d_tgt,
                            p_pred, p_tgt, e_pred, e_tgt, src_len, mel_len)
    outs = jax.block_until_ready(outs)

    ref = _reference_loss(mel, mel_target, log_d_pred, log_d_tgt,
                          p_pred, p_tgt, e_pred, e_tgt, src_len, mel_len)

    for got, want in zip(outs, ref):
        assert jnp.allclose(got, want, rtol=1e-5, atol=1e-5), (got, want)

    print("KERNEL_OK")
</pallas_src>

<mosaic_0001>
module attributes {stable_mosaic.version = 11 : i64} {
  func.func @_loss_kernel(%arg0: i32, %arg1: i32, %arg2: memref<2x1xi32, #tpu.memory_space<vmem>>, %arg3: memref<6x2xi32, #tpu.memory_space<vmem>>, %arg4: memref<2x256xf32, #tpu.memory_space<vmem>>, %arg5: memref<2x256xf32, #tpu.memory_space<vmem>>, %arg6: memref<6x8xf32, #tpu.memory_space<vmem>>, %arg7: memref<6x8xf32, #tpu.memory_space<vmem>>, %arg8: memref<1x1x1x4xf32, #tpu.memory_space<vmem>>) attributes {dimension_semantics = [#tpu.dimension_semantics<parallel>, #tpu.dimension_semantics<parallel>], iteration_bounds = array<i64: 1, 1>, scalar_prefetch = 0 : i64, scratch_operands = 0 : i64, tpu.core_type = #tpu.core_type<tc>, window_params = [{transform_indices = @transform_0, window_bounds = array<i64: 2, 1>}, {transform_indices = @transform_1, window_bounds = array<i64: 6, 2>}, {transform_indices = @transform_2, window_bounds = array<i64: 2, 256>}, {transform_indices = @transform_3, window_bounds = array<i64: 2, 256>}, {transform_indices = @transform_4, window_bounds = array<i64: 6, 8>}, {transform_indices = @transform_5, window_bounds = array<i64: 6, 8>}, {transform_indices = @transform_6, window_bounds = array<i64: 1, 1, 1, 4>}]} {
    %c0 = arith.constant 0 : index
    %c0_0 = arith.constant 0 : index
    %0 = vector.load %arg2[%c0, %c0_0] : memref<2x1xi32, #tpu.memory_space<vmem>>, vector<2x1xi32>
    %c0_1 = arith.constant 0 : index
    %c0_2 = arith.constant 0 : index
    %1 = vector.load %arg4[%c0_1, %c0_2] : memref<2x256xf32, #tpu.memory_space<vmem>>, vector<2x256xf32>
    %c0_3 = arith.constant 0 : index
    %c0_4 = arith.constant 0 : index
    %2 = vector.load %arg5[%c0_3, %c0_4] : memref<2x256xf32, #tpu.memory_space<vmem>>, vector<2x256xf32>
    %3 = arith.subf %1, %2 : vector<2x256xf32>
    %4 = math.absf %3 : vector<2x256xf32>
    %5 = tpu.iota {dimensions = array<i32: 1>} : vector<2x256xi32>
    %c256_i32 = arith.constant 256 : i32
    %6 = arith.muli %arg1, %c256_i32 : i32
    %7 = vector.broadcast %6 : i32 to vector<2x256xi32>
    %8 = arith.addi %5, %7 : vector<2x256xi32>
    %c16_i32 = arith.constant 16 : i32
    %9 = vector.broadcast %c16_i32 : i32 to vector<2x1xi32>
    %10 = arith.muli %0, %9 : vector<2x1xi32>
    %11 = vector.broadcast %10 : vector<2x1xi32> to vector<2x256xi32>
    %12 = arith.cmpi slt, %8, %11 : vector<2x256xi32>
    %cst = arith.constant 0.000000e+00 : f32
    %13 = vector.broadcast %cst : f32 to vector<2x256xf32>
    %14 = arith.select %12, %4, %13 : vector<2x256xi1>, vector<2x256xf32>
    %15 = arith.sitofp %10 : vector<2x1xi32> to vector<2x1xf32>
    %cst_5 = arith.constant 1.000000e+00 : f32
    %16 = vector.broadcast %cst_5 : f32 to vector<2x1xf32>
    %17 = arith.maximumf %15, %16 : vector<2x1xf32>
    %cst_6 = arith.constant dense<0.000000e+00> : vector<2xf32>
    %18 = vector.multi_reduction <add>, %14, %cst_6 [1] : vector<2x256xf32> to vector<2xf32>
    %19 = vector.shape_cast %18 : vector<2xf32> to vector<2x1xf32>
    %20 = arith.divf %19, %17 : vector<2x1xf32>
    %21 = vector.shape_cast %20 : vector<2x1xf32> to vector<1x2x1xf32>
    %cst_7 = arith.constant dense<0.000000e+00> : vector<1xf32>
    %22 = vector.multi_reduction <add>, %21, %cst_7 [1, 2] : vector<1x2x1xf32> to vector<1xf32>
    %23 = vector.shape_cast %22 : vector<1xf32> to vector<1x1x1xf32>
    %24 = vector.extract %23[0, 0, 0] : f32 from vector<1x1x1xf32>
    %c0_8 = arith.constant 0 : index
    %c0_9 = arith.constant 0 : index
    %25 = vector.load %arg3[%c0_8, %c0_9] : memref<6x2xi32, #tpu.memory_space<vmem>>, vector<6x1xi32>
    %c0_10 = arith.constant 0 : index
    %c1 = arith.constant 1 : index
    %26 = vector.load %arg3[%c0_10, %c1] : memref<6x2xi32, #tpu.memory_space<vmem>>, vector<6x1xi32>
    %c0_11 = arith.constant 0 : index
    %c0_12 = arith.constant 0 : index
    %27 = vector.load %arg6[%c0_11, %c0_12] : memref<6x8xf32, #tpu.memory_space<vmem>>, vector<6x8xf32>
    %c0_13 = arith.constant 0 : index
    %c0_14 = arith.constant 0 : index
    %28 = vector.load %arg7[%c0_13, %c0_14] : memref<6x8xf32, #tpu.memory_space<vmem>>, vector<6x8xf32>
    %29 = arith.subf %27, %28 : vector<6x8xf32>
    %30 = arith.mulf %29, %29 : vector<6x8xf32>
    %31 = tpu.iota {dimensions = array<i32: 1>} : vector<6x8xi32>
    %32 = vector.broadcast %25 : vector<6x1xi32> to vector<6x8xi32>
    %33 = arith.cmpi slt, %31, %32 : vector<6x8xi32>
    %cst_15 = arith.constant 0.000000e+00 : f32
    %34 = vector.broadcast %cst_15 : f32 to vector<6x8xf32>
    %35 = arith.select %33, %30, %34 : vector<6x8xi1>, vector<6x8xf32>
    %cst_16 = arith.constant dense<0.000000e+00> : vector<6xf32>
    %36 = vector.multi_reduction <add>, %35, %cst_16 [1] : vector<6x8xf32> to vector<6xf32>
    %37 = vector.shape_cast %36 : vector<6xf32> to vector<6x1xf32>
    %38 = arith.sitofp %25 : vector<6x1xi32> to vector<6x1xf32>
    %cst_17 = arith.constant 1.000000e+00 : f32
    %39 = vector.broadcast %cst_17 : f32 to vector<6x1xf32>
    %40 = arith.maximumf %38, %39 : vector<6x1xf32>
    %41 = arith.divf %37, %40 : vector<6x1xf32>
    %c0_i32 = arith.constant 0 : i32
    %42 = arith.cmpi eq, %arg1, %c0_i32 : i32
    %cst_18 = arith.constant 1.000000e+00 : f32
    %cst_19 = arith.constant 0.000000e+00 : f32
    %43 = arith.select %42, %cst_18, %cst_19 : f32
    %c0_i32_20 = arith.constant 0 : i32
    %44 = vector.broadcast %c0_i32_20 : i32 to vector<6x1xi32>
    %45 = arith.cmpi eq, %26, %44 : vector<6x1xi32>
    %cst_21 = arith.constant 0.000000e+00 : f32
    %46 = vector.broadcast %cst_21 : f32 to vector<6x1xf32>
    %47 = arith.select %45, %41, %46 : vector<6x1xi1>, vector<6x1xf32>
    %48 = vector.shape_cast %47 : vector<6x1xf32> to vector<1x6x1xf32>
    %cst_22 = arith.constant dense<0.000000e+00> : vector<1xf32>
    %49 = vector.multi_reduction <add>, %48, %cst_22 [1, 2] : vector<1x6x1xf32> to vector<1xf32>
    %50 = vector.shape_cast %49 : vector<1xf32> to vector<1x1x1xf32>
    %51 = vector.extract %50[0, 0, 0] : f32 from vector<1x1x1xf32>
    %52 = arith.mulf %51, %43 : f32
    %c1_i32 = arith.constant 1 : i32
    %53 = vector.broadcast %c1_i32 : i32 to vector<6x1xi32>
    %54 = arith.cmpi eq, %26, %53 : vector<6x1xi32>
    %cst_23 = arith.constant 0.000000e+00 : f32
    %55 = vector.broadcast %cst_23 : f32 to vector<6x1xf32>
    %56 = arith.select %54, %41, %55 : vector<6x1xi1>, vector<6x1xf32>
    %57 = vector.shape_cast %56 : vector<6x1xf32> to vector<1x6x1xf32>
    %cst_24 = arith.constant dense<0.000000e+00> : vector<1xf32>
    %58 = vector.multi_reduction <add>, %57, %cst_24 [1, 2] : vector<1x6x1xf32> to vector<1xf32>
    %59 = vector.shape_cast %58 : vector<1xf32> to vector<1x1x1xf32>
    %60 = vector.extract %59[0, 0, 0] : f32 from vector<1x1x1xf32>
    %61 = arith.mulf %60, %43 : f32
    %c2_i32 = arith.constant 2 : i32
    %62 = vector.broadcast %c2_i32 : i32 to vector<6x1xi32>
    %63 = arith.cmpi eq, %26, %62 : vector<6x1xi32>
    %cst_25 = arith.constant 0.000000e+00 : f32
    %64 = vector.broadcast %cst_25 : f32 to vector<6x1xf32>
    %65 = arith.select %63, %41, %64 : vector<6x1xi1>, vector<6x1xf32>
    %66 = vector.shape_cast %65 : vector<6x1xf32> to vector<1x6x1xf32>
    %cst_26 = arith.constant dense<0.000000e+00> : vector<1xf32>
    %67 = vector.multi_reduction <add>, %66, %cst_26 [1, 2] : vector<1x6x1xf32> to vector<1xf32>
    %68 = vector.shape_cast %67 : vector<1xf32> to vector<1x1x1xf32>
    %69 = vector.extract %68[0, 0, 0] : f32 from vector<1x1x1xf32>
    %70 = arith.mulf %69, %43 : f32
    %71 = tpu.iota {dimensions = array<i32: 1>} : vector<1x4xi32>
    %c0_i32_27 = arith.constant 0 : i32
    %72 = vector.broadcast %c0_i32_27 : i32 to vector<1x4xi32>
    %73 = arith.cmpi eq, %71, %72 : vector<1x4xi32>
    %cst_28 = arith.constant 0.000000e+00 : f32
    %74 = vector.broadcast %24 : f32 to vector<1x4xf32>
    %75 = vector.broadcast %cst_28 : f32 to vector<1x4xf32>
    %76 = arith.select %73, %74, %75 : vector<1x4xi1>, vector<1x4xf32>
    %c1_i32_29 = arith.constant 1 : i32
    %77 = vector.broadcast %c1_i32_29 : i32 to vector<1x4xi32>
    %78 = arith.cmpi eq, %71, %77 : vector<1x4xi32>
    %cst_30 = arith.constant 0.000000e+00 : f32
    %79 = vector.broadcast %52 : f32 to vector<1x4xf32>
    %80 = vector.broadcast %cst_30 : f32 to vector<1x4xf32>
    %81 = arith.select %78, %79, %80 : vector<1x4xi1>, vector<1x4xf32>
    %82 = arith.addf %76, %81 : vector<1x4xf32>
    %c2_i32_31 = arith.constant 2 : i32
    %83 = vector.broadcast %c2_i32_31 : i32 to vector<1x4xi32>
    %84 = arith.cmpi eq, %71, %83 : vector<1x4xi32>
    %cst_32 = arith.constant 0.000000e+00 : f32
    %85 = vector.broadcast %61 : f32 to vector<1x4xf32>
    %86 = vector.broadcast %cst_32 : f32 to vector<1x4xf32>
    %87 = arith.select %84, %85, %86 : vector<1x4xi1>, vector<1x4xf32>
    %88 = arith.addf %82, %87 : vector<1x4xf32>
    %c3_i32 = arith.constant 3 : i32
    %89 = vector.broadcast %c3_i32 : i32 to vector<1x4xi32>
    %90 = arith.cmpi eq, %71, %89 : vector<1x4xi32>
    %cst_33 = arith.constant 0.000000e+00 : f32
    %91 = vector.broadcast %70 : f32 to vector<1x4xf32>
    %92 = vector.broadcast %cst_33 : f32 to vector<1x4xf32>
    %93 = arith.select %90, %91, %92 : vector<1x4xi1>, vector<1x4xf32>
    %94 = arith.addf %88, %93 : vector<1x4xf32>
    %95 = vector.shape_cast %94 : vector<1x4xf32> to vector<1x1x1x4xf32>
    %c0_34 = arith.constant 0 : index
    %c0_35 = arith.constant 0 : index
    %c0_36 = arith.constant 0 : index
    %c0_37 = arith.constant 0 : index
    %96 = vector.load %arg8[%c0_34, %c0_35, %c0_36, %c0_37] : memref<1x1x1x4xf32, #tpu.memory_space<vmem>>, vector<1x1x1x4xf32>
    tpu.vector_store %arg8[%c0_34, %c0_35, %c0_36, %c0_37], %95 {strides = array<i32>} : memref<1x1x1x4xf32, #tpu.memory_space<vmem>>, vector<1x1x1x4xf32>,
    return
  }
  func.func @transform_0(%arg0: i32, %arg1: i32) -> (i32, i32) {
    %c0_i32 = arith.constant 0 : i32
    %c0_i32_0 = arith.constant 0 : i32
    return %arg0, %c0_i32 : i32, i32
  }
  func.func @transform_1(%arg0: i32, %arg1: i32) -> (i32, i32) {
    %c0_i32 = arith.constant 0 : i32
    %c0_i32_0 = arith.constant 0 : i32
    return %arg0, %c0_i32 : i32, i32
  }
  func.func @transform_2(%arg0: i32, %arg1: i32) -> (i32, i32) {
    %c0_i32 = arith.constant 0 : i32
    return %arg0, %arg1 : i32, i32
  }
  func.func @transform_3(%arg0: i32, %arg1: i32) -> (i32, i32) {
    %c0_i32 = arith.constant 0 : i32
    return %arg0, %arg1 : i32, i32
  }
  func.func @transform_4(%arg0: i32, %arg1: i32) -> (i32, i32) {
    %c0_i32 = arith.constant 0 : i32
    %c0_i32_0 = arith.constant 0 : i32
    return %arg0, %c0_i32 : i32, i32
  }
  func.func @transform_5(%arg0: i32, %arg1: i32) -> (i32, i32) {
    %c0_i32 = arith.constant 0 : i32
    %c0_i32_0 = arith.constant 0 : i32
    return %arg0, %c0_i32 : i32, i32
  }
  func.func @transform_6(%arg0: i32, %arg1: i32) -> (i32, i32, i32, i32) {
    %c0_i32 = arith.constant 0 : i32
    %c0_i32_0 = arith.constant 0 : i32
    %c0_i32_1 = arith.constant 0 : i32
    return %arg0, %arg1, %c0_i32, %c0_i32_0 : i32, i32, i32, i32
  }
}

</mosaic_0001>

<bundles_post_ra>
// kernel: tpu_custom_call.1
= control target key start
LH: loop header
LB: loop body
LE: loop exit
PB: predicated region body
PF: predicated region fallthrough
CT: control target
= control target key end

     0   :  { %11 = vsyncpa [#allocation3], 0  ;;  %s368_s0 = inlined_call_operand.vmem [shape: s32[2,1], index: 0, kind: input, shape index: {}]   ;;  %s369_s1 = inlined_call_operand.vmem [shape: s32[6,2], index: 1, kind: input, shape index: {}]   ;;  %s370_s2 = inlined_call_operand.hbm [shape: f32[2,256], index: 2, kind: input, shape index: {}]   ;;  %s371_s3 = inlined_call_operand.hbm [shape: f32[2,256], index: 3, kind: input, shape index: {}]   ;;  %s372_s4 = inlined_call_operand.vmem [shape: f32[6,8], index: 4, kind: input, shape index: {}]   ;;  %s373_s5 = inlined_call_operand.vmem [shape: f32[6,8], index: 5, kind: input, shape index: {}]   ;;  %s374_s6 = inlined_call_operand.hbm [shape: f32[1,1,1,4], index: 6, kind: output, shape index: {}]  }
   0x1   :  { %12 = vsyncpa [#allocation6], 0 }
   0x2   :  { %13 = vsyncpa [#allocation4], 0  ;;  %s296_s21 = smov [#allocation2]   ;;  %s297_s23 = smov [#allocation5]  }
   0x3   :  { %s24_s22 = sshll.u32 %s296_s21, 4  ;;  %s34_s24 = sshll.u32 %s297_s23, 4  ;;  %s25_s22 = int_to_ptr.vmem [resolvable:$true] %s24_s22  ;;  %s35_s24 = int_to_ptr.vmem [resolvable:$true] %s34_s24 }
   0x4   :  { %s238_s25 = scalar_lea.vmem %s25_s22, 64  ;;  %p243_p1 = scmp.lt.s32.totalorder %s25_s22, %s25_s22 }
   0x5   :  { %p239_p0 = scmp.ne.s32.totalorder %s25_s22, %s238_s25  ;;  %p244_p2 = scmp.lt.s32.totalorder %s238_s25, %s238_s25 }
   0x7   :  { %p245_p3 = por %p244_p2, %p243_p1 }
   0x9   :  { %p246_p4 = pnand %p245_p3, %p239_p0 }
   0xb   :  { %249 = shalt.err (!%p246_p4)
}
   0xc   :  { %27 = dma.hbm_to_vmem [thread:$0]  %s370_s2, 64, %s25_s22, [#allocation3]  }
   0xd   :  { %s258_s28 = scalar_lea.vmem %s35_s24, 64  ;;  %p263_p6 = scmp.lt.s32.totalorder %s35_s24, %s35_s24 }
   0xe   :  { %p259_p5 = scmp.ne.s32.totalorder %s35_s24, %s258_s28  ;;  %p264_p7 = scmp.lt.s32.totalorder %s258_s28, %s258_s28 }
  0x10   :  { %p265_p8 = por %p264_p7, %p263_p6 }
  0x12   :  { %p266_p9 = pnand %p265_p8, %p259_p5 }
  0x14   :  { %269 = shalt.err (!%p266_p9)
}
  0x15   :  { %37 = dma.hbm_to_vmem [thread:$0]  %s371_s3, 64, %s35_s24, [#allocation6]  }
  0x16   :  { %290 = dma.done.wait [#allocation3], 64  }
  0x17   :  { %291 = vsyncadd [#allocation3], 4294967232 }
  0x18   :  { %292 = dma.done.wait [#allocation6], 64  }
  0x19   :  { %293 = vsyncadd [#allocation6], 4294967232  ;;  %v298_v0 = vmov 0   ;;  %v100_v1 = vld [vmem:[%s369_s1] sm:$0x3f]  ;;  %v53_v6 = vlaneseq  ;;  %vm110_vm0 = vcmask 62464  }
  0x1a   :  { %224 = vset.pattern.permute.xlu0 %v298_v0  ;;  %225 = vset.pattern.permute.xlu1 %v298_v0  ;;  %v48_v2 = vld [vmem:[%s368_s0] sm:$0x3]  ;;  %v114_v13 = vcvt.s32.f32 %v100_v1  ;;  %s299_s0 = smov 1   ;;  %v300_v18 = vmov 1983009808   ;;  %vm81_vm4 = vcmask 1041408  }
  0x1b   :  { %106 = vperm.xlu0 %224, %v100_v1   ;;  %v60_v3 = vmul.u32 16, %v48_v2  ;;  %v101_v4 = vld [vmem:[%s372_s4] sm:$0x3f]  ;;  %v356_v8 = vand.u32 127, %v53_v6  ;;  %v68_v19 = vunpack.c.l.s4 %v300_v18  ;;  %v71_v24 = vshrl.u32 %v53_v6, 7  ;;  %s301_s1 = smov 127  }
  0x1c   :  { %v102_v5 = vld [vmem:[%s373_s5] sm:$0x3f]  ;;  %v115_v14 = vmax.f32 %v114_v13, 1.0  ;;  %vm142_vm5 = vcmp.eq.s32.totalorder %v100_v1, 1  ;;  %vm120_vm6 = vcmp.eq.s32.totalorder %v100_v1, 0  ;;  %vm159_vm7 = vcmp.eq.s32.totalorder %v100_v1, 2 }
  0x1d   :  { %62 = vperm.xlu1 %225, %v60_v3   ;;  %v103_v7 = vsub.f32 %v101_v4, %v102_v5  ;;  %v49_v20 = vld [vmem:[#allocation2] sm:$0xf]  ;;  %v50_v21 = vld [vmem:[#allocation5] sm:$0xf]  ;;  %v69_v23 = vunpack.c.0.s8 %v68_v19  ;;  %v55_v28 = vadd.s32 128, %v356_v8  ;;  %v79_v40 = vcvt.s32.f32 %v60_v3  ;;  %s302_s15 = smov [#allocation7]  }
  0x1e   :  { %226 = vrcp.f32 %v115_v14  ;;  %v51_v22 = vsub.f32 %v49_v20, %v50_v21  ;;  %vm89_vm8 = vcmask 1024   ;;  %vm130_vm9 = vcmask 5120   ;;  %s199_s16 = sshll.u32 %s302_s15, 4  ;;  %s200_s16 = int_to_ptr.vmem [resolvable:$true] %s199_s16 }
  0x1f   :  { %v104_v9 = vmul.f32 %v103_v7, %v103_v7  ;;  %v72_v26 = vsub.s32 %v69_v23, %v71_v24  ;;  %v80_v41 = vmax.f32 %v79_v40, 1.0  ;;  %vm176_vm10 = vcmp.eq.s32.totalorder %v356_v8, 0  ;;  %s270_s17 = scalar_lea.vmem %s200_s16, 16  ;;  %s274_s18 = scalar_lea.vmem %s200_s16, 32 }
  0x20   :  { %v52_v25 = vand.u32 2147483647, %v51_v22  ;;  %vm179_vm11 = vcmp.eq.s32.totalorder %v356_v8, 1  ;;  %vm183_vm12 = vcmp.eq.s32.totalorder %v356_v8, 2  ;;  %vm187_vm13 = vcmp.eq.s32.totalorder %v356_v8, 3  ;;  %p271_p10 = scmp.ne.s32.totalorder %s200_s16, %s270_s17  ;;  %p275_p11 = scmp.lt.s32.totalorder %s200_s16, %s200_s16 }
  0x21   :  { %228 = vrcp.f32 %v80_v41  ;;  %vm191_vm14 = vcmask 24576   ;;  %p276_p12 = scmp.lt.s32.totalorder %s274_s18, %s270_s17 }
  0x22   :  { %v73_v27 = vrot.slane %v52_v25, %v72_v26 }
  0x23   :  { %p277_p13 = por %p276_p12, %p275_p11 }
  0x24   :  { %v74_v30 = vcombine.high %v73_v27, %v73_v27 }
  0x25   :  { %p278_p0 = pnand %p277_p13, %p271_p10 }
  0x2b   :  { %v227_v15 = vpop.eup %226 }
  0x2e   :  { %v229_v42 = vpop.eup %228 }
  0x96   :  { %v107_v10 = vpop.permute.xlu0 %106 }
  0x97   :  { %vm108_vm1 = vcmp.lt.s32.totalorder %v356_v8, %v107_v10 }
  0x98   :  { %v109_v11 = vsel %vm108_vm1, %v104_v9, 0.0  ;;  %v63_v29 = vpop.permute.xlu1 %62 }
  0x99   :  { %v111_v12 = vsel %vm110_vm0, %v109_v11, 0.0  ;;  %vm64_vm2 = vcmp.lt.s32.totalorder %v356_v8, %v63_v29  ;;  %vm65_vm3 = vcmp.lt.s32.totalorder %v55_v28, %v63_v29 }
  0x9a   :  { %112 = vadd.xlane.f32.xlu0 %v111_v12  ;;  %v77_v31 = vsel %vm64_vm2, %v73_v27, 0.0  ;;  %v78_v32 = vsel %vm65_vm3, %v74_v30, 0.0 }
  0x9b   :  { %v82_v33 = vsel %vm81_vm4, %v77_v31, 0.0  ;;  %v83_v34 = vsel %vm81_vm4, %v78_v32, 0.0 }
  0x9c   :  { %v84_v35 = vadd.f32 %v83_v34, %v82_v33 }
 0x123   :  { %v113_v16 = vpop.xlane.xlu0 %112 }
 0x124   :  { %v117_v17 = vmul.f32 %v227_v15, %v113_v16 }
 0x126   :  { %122 = vrot.lane.b32.xlu1 %v117_v17, %s299_s0 }
 0x14a   :  { %85 = vadd.xlane.f32.xlu1 %v84_v35 }
 0x198   :  { %v123_v36 = vpop.permute.xlu1 %122 }
 0x199   :  { %v143_v37 = vsel %vm142_vm5, %v123_v36, 0.0  ;;  %v125_v38 = vsel %vm120_vm6, %v123_v36, 0.0  ;;  %v160_v39 = vsel %vm159_vm7, %v123_v36, 0.0 }
 0x19a   :  { %145 = vrot.lane.b32.xlu1 %v143_v37, %s301_s1  ;;  %127 = vrot.lane.b32.xlu0 %v125_v38, %s301_s1 }
 0x19e   :  { %162 = vrot.lane.b32.xlu0 %v160_v39, %s301_s1 }
 0x1d3   :  { %v86_v43 = vpop.xlane.xlu1 %85 }
 0x1d4   :  { %v88_v44 = vmul.f32 %v229_v42, %v86_v43 }
 0x1d6   :  { %v90_v45 = vsel %vm89_vm8, %v88_v44, 0.0 }
 0x1d7   :  { %91 = vadd.xlane.f32.xlu0 %v90_v45 }
 0x20c   :  { %v128_v46 = vpop.permute.xlu0 %127  ;;  %v146_v47 = vpop.permute.xlu1 %145 }
 0x20d   :  { %v131_v48 = vsel %vm130_vm9, %v128_v46, 0.0  ;;  %v148_v49 = vsel %vm130_vm9, %v146_v47, 0.0 }
 0x20e   :  { %132 = vadd.xlane.f32.xlu1 %v131_v48  ;;  %149 = vadd.xlane.f32.xlu0 %v148_v49 }
 0x210   :  { %v163_v50 = vpop.permute.xlu0 %162 }
 0x211   :  { %v165_v51 = vsel %vm130_vm9, %v163_v50, 0.0 }
 0x212   :  { %166 = vadd.xlane.f32.xlu0 %v165_v51 }
 0x260   :  { %v92_v52 = vpop.xlane.xlu0 %91 }
 0x261   :  { %v93_v53 = vrot.slane %v92_v52, 4 }
 0x263   :  { %v94_v54 = vadd.f32 %v93_v53, %v92_v52 }
 0x265   :  { %v95_v55 = vrot.slane %v94_v54, 2 }
 0x267   :  { %v96_v56 = vadd.f32 %v95_v55, %v94_v54 }
 0x269   :  { %v97_v57 = vrot.slane %v96_v56, 1 }
 0x26b   :  { %v98_v58 = vadd.f32 %v97_v57, %v96_v56 }
 0x26d   :  { %209 = vpush %v98_v58 }
 0x297   :  { %v133_v59 = vpop.xlane.xlu1 %132  ;;  %v150_v60 = vpop.xlane.xlu0 %149 }
 0x298   :  { %v134_v61 = vrot.slane %v133_v59, 4  ;;  %v151_v62 = vrot.slane %v150_v60, 4 }
 0x29a   :  { %v135_v63 = vadd.f32 %v134_v61, %v133_v59  ;;  %v152_v0 = vadd.f32 %v151_v62, %v150_v60 }
 0x29b   :  { %v167_v1 = vpop.xlane.xlu0 %166 }
 0x29c   :  { %v136_v2 = vrot.slane %v135_v63, 2  ;;  %v153_v3 = vrot.slane %v152_v0, 2  ;;  %v168_v4 = vrot.slane %v167_v1, 4 }
 0x29e   :  { %v137_v5 = vadd.f32 %v136_v2, %v135_v63  ;;  %v169_v6 = vadd.f32 %v168_v4, %v167_v1  ;;  %v154_v7 = vadd.f32 %v153_v3, %v152_v0  ;;  %s210_s4 = spop %209 }
 0x29f   :  { %v177_v17 = vstv %s210_s4 }
 0x2a0   :  { %v170_v9 = vrot.slane %v169_v6, 2  ;;  %v138_v10 = vrot.slane %v137_v5, 1  ;;  %v155_v11 = vrot.slane %v154_v7, 1  ;;  %v178_v19 = vsel %vm176_vm10, %v177_v17, 0.0 }
 0x2a2   :  { %v171_v12 = vadd.f32 %v170_v9, %v169_v6  ;;  %v139_v13 = vadd.f32 %v138_v10, %v137_v5  ;;  %v156_v14 = vadd.f32 %v155_v11, %v154_v7 }
 0x2a4   :  { %211 = vpush %v139_v13  ;;  %v172_v15 = vrot.slane %v171_v12, 1 }
 0x2a5   :  { %213 = vpush %v156_v14 }
 0x2a6   :  { %v173_v16 = vadd.f32 %v172_v15, %v171_v12 }
 0x2a8   :  { %215 = vpush %v173_v16 }
 0x2d5   :  { %s212_s5 = spop %211 }
 0x2d6   :  { %v180_v18 = vstv %s212_s5  ;;  %s214_s13 = spop %213 }
 0x2d7   :  { %v181_v20 = vsel %vm179_vm11, %v180_v18, 0.0  ;;  %v184_v21 = vstv %s214_s13 }
 0x2d8   :  { %v182_v22 = vadd.f32 %v181_v20, %v178_v19  ;;  %v185_v23 = vsel %vm183_vm12, %v184_v21, 0.0 }
 0x2d9   :  { %s216_s14 = spop %215 }
 0x2da   :  { %v186_v24 = vadd.f32 %v185_v23, %v182_v22  ;;  %v188_v25 = vstv %s216_s14 }
 0x2db   :  { %v189_v26 = vsel %vm187_vm13, %v188_v25, 0.0 }
 0x2dc   :  { %v190_v27 = vadd.f32 %v189_v26, %v186_v24 }
 0x2de   :  { %192 = vst.msk [vmem:[#allocation7] sm:$0x1] %vm191_vm14, %v190_v27 }
 0x2df   :  { %281 = shalt.err (!%p278_p0)
}
 0x2e0   :  { %202 = dma.vmem_to_hbm [thread:$0]  %s200_s16, 16, %s374_s6, [#allocation4]  }
 0x2e1   :  { %294 = dma.done.wait [#allocation4], 16  }
 0x2e2   :  { %295 = vsyncadd [#allocation4], 4294967280 }
 0x2e3   :  { %206 = vsyncpa [#allocation3], 1 }
 0x2e4   :  { %207 = vsyncpa [#allocation6], 1 }
 0x2e5   :  { %208 = vsyncpa [#allocation4], 1 }

</bundles_post_ra>
